<compile_context>
chip_gen: v6e
topology: v6e:2x2x1
jax: 0.10.0
libtpu: 0.0.40
codegen_flags: <defaults>
</compile_context>

<pallas_src>
import functools
import math

import jax
import jax.numpy as jnp
from jax.experimental import pallas as pl
from jax.experimental.pallas import tpu as pltpu


# --------------------------------------------------------------------------------------
# Kernels
# --------------------------------------------------------------------------------------
def _conv_vector(w_ref, b_ref, stu_ref):
    """Kernel-size-1 Conv1d over S channels == S scalar*vector FMAs on the VPU."""
    S = stu_ref.shape[0]
    acc = w_ref[0] * stu_ref[0:1, :]
    for c in range(1, S):                       # S is tiny & static -> unrolled
        acc = acc + w_ref[c] * stu_ref[c:c + 1, :]
    return acc + b_ref[0]                       # (1, P) f32


def _kernel_split(w_ref, b_ref, stu_ref, x_ref, out_ref):
    # Standard layout: out block is (TB, P+D).  Two direct slice stores (no in-register
    # concatenate): the x half streams load->store untouched, the broadcast half is a
    # sublane-broadcast store.  Avoids lane-shift/merge + full-row vreg materialization.
    S, P = stu_ref.shape
    TB = x_ref.shape[0]
    new_vec = _conv_vector(w_ref, b_ref, stu_ref).astype(out_ref.dtype)
    out_ref[:, :P] = jnp.broadcast_to(new_vec, (TB, P))
    xv = x_ref[...]
    out_ref[:, P:] = xv if xv.dtype == out_ref.dtype else xv.astype(out_ref.dtype)


def _kernel_folded(P, D, r, w_ref, b_ref, stu_ref, x_ref, out_ref):
    # Lane-dense layout: r batch rows folded into one kernel row, so the out block's
    # last dim is r*(P+D) (a multiple of 128).  The interleave [vec | x_j] * r happens
    # once in registers; the store / HBM writeback is fully lane-dense.
    TBf = x_ref.shape[0]
    new_vec = _conv_vector(w_ref, b_ref, stu_ref).astype(out_ref.dtype)
    vec_tile = jnp.broadcast_to(new_vec, (TBf, P))
    xv = x_ref[...]
    if xv.dtype != out_ref.dtype:
        xv = xv.astype(out_ref.dtype)
    pieces = []
    for j in range(r):                          # static, fully unrolled interleave
        pieces.append(vec_tile)
        pieces.append(xv[:, j * D:(j + 1) * D])
    out_ref[...] = jnp.concatenate(pieces, axis=1)


# --------------------------------------------------------------------------------------
# Wrapper
# --------------------------------------------------------------------------------------
def _round_down(v, m):
    return (v // m) * m


def _default_batch_tile(rows, in_w, out_w, itemsize, sublane):
    """VMEM-budget-derived batch tile (rows = kernel rows, possibly folded)."""
    budget = 24 << 20                                  # working budget for x+out tiles
    per_row = 2 * itemsize * (in_w + out_w)            # double-buffered in + out
    tb_vmem = max(sublane, _round_down(budget // per_row, sublane))
    if rows >= 512:
        # >= 4 grid steps: DMA/compute pipelining + dual-TensorCore sharding on v7x.
        tb = max(sublane, _round_down(pl.cdiv(rows, 4), sublane))
        tb = min(tb, 512, tb_vmem)
    else:
        # Tiny/moderate problems are per-step-overhead dominated: one block if it fits.
        tb = rows if rows <= tb_vmem else tb_vmem
    return min(tb, rows)


def transform_stu_forward(stu_vectors, conv_w, conv_b, x, *, batch_tile=None,
                          lane_dense=None):
    """Transform_stu forward.

    stu_vectors: (S, P) f32; conv_w: (1, S) or (S,); conv_b: (1,); x: (B, D).
    Returns (B, P+D) with dtype x.dtype.  `batch_tile` refers to kernel rows (which are
    folded batch rows on the lane-dense path).  The conv result is computed in f32 and
    cast to x.dtype (precision contract).
    """
    stu_vectors = jnp.asarray(stu_vectors, jnp.float32)
    S, P = stu_vectors.shape
    B, D = x.shape
    W = P + D
    out_dtype = x.dtype
    itemsize = jnp.dtype(out_dtype).itemsize
    # Sublane packing: 8 rows for 4-byte, 16 for 2-byte, 32 for 1-byte dtypes.
    sublane = 8 * (4 // itemsize) if itemsize in (1, 2, 4) else 8

    w_flat = jnp.asarray(conv_w, jnp.float32).reshape(S)    # SMEM scalar table
    b_flat = jnp.asarray(conv_b, jnp.float32).reshape(1)    # SMEM scalar

    # Lane-dense folding: only for f32, narrow output rows, and B divisible by the fold.
    r = 1
    if W < 128 and itemsize == 4 and lane_dense is not False:
        cand = 128 // math.gcd(W, 128)
        if cand <= 32 and B % cand == 0:
            if lane_dense is True or (lane_dense is None and B // cand >= 32):
                r = cand

    rows = B // r
    in_w = r * D
    out_w = r * W

    if batch_tile is None:
        TB = _default_batch_tile(rows, in_w, out_w, itemsize, sublane)
    else:
        TB = min(batch_tile, rows)
        if TB != rows and TB % sublane != 0:
            raise ValueError(
                f"batch_tile must equal the row count ({rows}) or be a multiple of "
                f"{sublane} for dtype {out_dtype}")
    nb = pl.cdiv(rows, TB)

    # Row-major reshapes in the wrapper are free bitcasts.
    x_view = x if r == 1 else x.reshape(rows, in_w)

    cost = pl.CostEstimate(
        flops=2 * S * P * nb + B * W,
        transcendentals=0,
        bytes_accessed=itemsize * (B * D + B * W) + 4 * (S * P + S + 1),
    )

    kernel = _kernel_split if r == 1 else functools.partial(_kernel_folded, P, D, r)

    out = pl.pallas_call(
        kernel,
        out_shape=jax.ShapeDtypeStruct((rows, out_w), out_dtype),
        grid=(nb,),
        in_specs=[
            pl.BlockSpec(memory_space=pltpu.MemorySpace.SMEM),   # conv weight (S,)
            pl.BlockSpec(memory_space=pltpu.MemorySpace.SMEM),   # conv bias (1,)
            pl.BlockSpec((S, P), lambda i: (0, 0)),              # stu vectors, resident
            pl.BlockSpec((TB, in_w), lambda i: (i, 0)),          # x batch tile
        ],
        out_specs=pl.BlockSpec((TB, out_w), lambda i: (i, 0)),
        compiler_params=pltpu.CompilerParams(
            dimension_semantics=("parallel",),
            vmem_limit_bytes=32 << 20,          # matches the 24 MiB working budget
        ),
        cost_estimate=cost,
    )(w_flat, b_flat, stu_vectors, x_view)

    return out if r == 1 else out.reshape(B, W)


def _reference(stu_vectors, conv_w, conv_b, x):
    P = stu_vectors.shape[1]
    B = x.shape[0]
    ref_vec = jnp.asarray(conv_w, jnp.float32).reshape(1, -1) @ stu_vectors
    ref_vec = ref_vec + jnp.asarray(conv_b, jnp.float32).reshape(())
    return jnp.concatenate(
        [jnp.broadcast_to(ref_vec, (B, P)).astype(x.dtype), x], axis=1)


if __name__ == "__main__":
    # Deterministic synthetic parameters (module __init__ shapes):
    #   pp_dim = 32, len(s_ranges) = 4, batch B = 2, x feature dim D = 16.
    pp_dim = 32
    num_s_ranges = 4
    B, D = 2, 16

    key = jax.random.PRNGKey(0)
    k_stu, k_w, k_b, k_x = jax.random.split(key, 4)

    # nn.Parameter(torch.rand(pp_dim)) per s_range -> uniform [0, 1)
    stu_vectors = jax.random.uniform(k_stu, (num_s_ranges, pp_dim), dtype=jnp.float32)
    # Conv1d(num_s_ranges, 1, kernel_size=1): weight (1, S, 1) -> (1, S); bias (1,)
    conv_w = jax.random.normal(k_w, (1, num_s_ranges), dtype=jnp.float32) * 0.1
    conv_b = jax.random.normal(k_b, (1,), dtype=jnp.float32) * 0.1
    x = jax.random.normal(k_x, (B, D), dtype=jnp.float32)

    # Tiny production-like config: single grid step, standard (split-store) path.
    out = jax.block_until_ready(transform_stu_forward(stu_vectors, conv_w, conv_b, x))
    ref = _reference(stu_vectors, conv_w, conv_b, x)
    assert out.shape == (B, pp_dim + D)
    assert jnp.allclose(out, ref, atol=1e-5, rtol=1e-5)

    # Tiled standard path with a NON-divisible batch (exercises partial edge block).
    B2 = 20
    x2 = jax.random.normal(jax.random.PRNGKey(1), (B2, D), dtype=jnp.float32)
    out2 = jax.block_until_ready(
        transform_stu_forward(stu_vectors, conv_w, conv_b, x2, batch_tile=8))
    ref2 = _reference(stu_vectors, conv_w, conv_b, x2)
    assert out2.shape == (B2, pp_dim + D)
    assert jnp.allclose(out2, ref2, atol=1e-5, rtol=1e-5)

    # Lane-dense folded path: rows are r*(P+D)=384 lanes wide, tiled over the folded
    # batch so the grid has multiple steps.
    B3 = 128
    x3 = jax.random.normal(jax.random.PRNGKey(2), (B3, D), dtype=jnp.float32)
    out3 = jax.block_until_ready(
        transform_stu_forward(stu_vectors, conv_w, conv_b, x3,
                              batch_tile=8, lane_dense=True))
    ref3 = _reference(stu_vectors, conv_w, conv_b, x3)
    assert out3.shape == (B3, pp_dim + D)
    assert jnp.allclose(out3, ref3, atol=1e-5, rtol=1e-5)

    print("KERNEL_OK")
</pallas_src>

<mosaic_0001>
module attributes {stable_mosaic.version = 11 : i64} {
  func.func @_kernel_split(%arg0: i32, %arg1: memref<4xf32, #tpu.memory_space<smem>>, %arg2: memref<1xf32, #tpu.memory_space<smem>>, %arg3: memref<4x32xf32, #tpu.memory_space<vmem>>, %arg4: memref<2x16xf32, #tpu.memory_space<vmem>>, %arg5: memref<2x48xf32, #tpu.memory_space<vmem>>) attributes {dimension_semantics = [#tpu.dimension_semantics<parallel>], iteration_bounds = array<i64: 1>, scalar_prefetch = 0 : i64, scratch_operands = 0 : i64, tpu.core_type = #tpu.core_type<tc>, window_params = [{transform_indices = @transform_0, window_bounds = array<i64: 4>}, {transform_indices = @transform_1, window_bounds = array<i64: 1>}, {pipeline_mode = #tpu.pipeline_mode<synchronous>, transform_indices = @transform_2, window_bounds = array<i64: 4, 32>}, {transform_indices = @transform_3, window_bounds = array<i64: 2, 16>}, {transform_indices = @transform_4, window_bounds = array<i64: 2, 48>}]} {
    %c0 = arith.constant 0 : index
    %0 = memref.load %arg1[%c0] : memref<4xf32, #tpu.memory_space<smem>>
    %c0_0 = arith.constant 0 : index
    %c0_1 = arith.constant 0 : index
    %1 = vector.load %arg3[%c0_0, %c0_1] : memref<4x32xf32, #tpu.memory_space<vmem>>, vector<1x32xf32>
    %2 = vector.broadcast %0 : f32 to vector<1x32xf32>
    %3 = arith.mulf %2, %1 : vector<1x32xf32>
    %c1 = arith.constant 1 : index
    %4 = memref.load %arg1[%c1] : memref<4xf32, #tpu.memory_space<smem>>
    %c1_2 = arith.constant 1 : index
    %c0_3 = arith.constant 0 : index
    %5 = vector.load %arg3[%c1_2, %c0_3] : memref<4x32xf32, #tpu.memory_space<vmem>>, vector<1x32xf32>
    %6 = vector.broadcast %4 : f32 to vector<1x32xf32>
    %7 = arith.mulf %6, %5 : vector<1x32xf32>
    %8 = arith.addf %3, %7 : vector<1x32xf32>
    %c2 = arith.constant 2 : index
    %9 = memref.load %arg1[%c2] : memref<4xf32, #tpu.memory_space<smem>>
    %c2_4 = arith.constant 2 : index
    %c0_5 = arith.constant 0 : index
    %10 = vector.load %arg3[%c2_4, %c0_5] : memref<4x32xf32, #tpu.memory_space<vmem>>, vector<1x32xf32>
    %11 = vector.broadcast %9 : f32 to vector<1x32xf32>
    %12 = arith.mulf %11, %10 : vector<1x32xf32>
    %13 = arith.addf %8, %12 : vector<1x32xf32>
    %c3 = arith.constant 3 : index
    %14 = memref.load %arg1[%c3] : memref<4xf32, #tpu.memory_space<smem>>
    %c3_6 = arith.constant 3 : index
    %c0_7 = arith.constant 0 : index
    %15 = vector.load %arg3[%c3_6, %c0_7] : memref<4x32xf32, #tpu.memory_space<vmem>>, vector<1x32xf32>
    %16 = vector.broadcast %14 : f32 to vector<1x32xf32>
    %17 = arith.mulf %16, %15 : vector<1x32xf32>
    %18 = arith.addf %13, %17 : vector<1x32xf32>
    %c0_8 = arith.constant 0 : index
    %19 = memref.load %arg2[%c0_8] : memref<1xf32, #tpu.memory_space<smem>>
    %20 = vector.broadcast %19 : f32 to vector<1x32xf32>
    %21 = arith.addf %18, %20 : vector<1x32xf32>
    %22 = vector.shape_cast %21 : vector<1x32xf32> to vector<1x32xf32>
    %23 = vector.broadcast %22 : vector<1x32xf32> to vector<2x32xf32>
    %c0_9 = arith.constant 0 : index
    %c0_10 = arith.constant 0 : index
    %24 = vector.load %arg5[%c0_9, %c0_10] : memref<2x48xf32, #tpu.memory_space<vmem>>, vector<2x32xf32>
    tpu.vector_store %arg5[%c0_9, %c0_10], %23 {strides = array<i32>} : memref<2x48xf32, #tpu.memory_space<vmem>>, vector<2x32xf32>,
    %c0_11 = arith.constant 0 : index
    %c0_12 = arith.constant 0 : index
    %25 = vector.load %arg4[%c0_11, %c0_12] : memref<2x16xf32, #tpu.memory_space<vmem>>, vector<2x16xf32>
    %c0_13 = arith.constant 0 : index
    %c32 = arith.constant 32 : index
    %26 = vector.load %arg5[%c0_13, %c32] : memref<2x48xf32, #tpu.memory_space<vmem>>, vector<2x16xf32>
    tpu.vector_store %arg5[%c0_13, %c32], %25 {strides = array<i32>} : memref<2x48xf32, #tpu.memory_space<vmem>>, vector<2x16xf32>,
    return
  }
  func.func @transform_0(%arg0: i32) -> i32 {
    %c0_i32 = arith.constant 0 : i32
    %c0_i32_0 = arith.constant 0 : i32
    return %c0_i32 : i32
  }
  func.func @transform_1(%arg0: i32) -> i32 {
    %c0_i32 = arith.constant 0 : i32
    %c0_i32_0 = arith.constant 0 : i32
    return %c0_i32 : i32
  }
  func.func @transform_2(%arg0: i32) -> (i32, i32) {
    %c0_i32 = arith.constant 0 : i32
    %c0_i32_0 = arith.constant 0 : i32
    %c0_i32_1 = arith.constant 0 : i32
    return %c0_i32, %c0_i32_0 : i32, i32
  }
  func.func @transform_3(%arg0: i32) -> (i32, i32) {
    %c0_i32 = arith.constant 0 : i32
    %c0_i32_0 = arith.constant 0 : i32
    return %arg0, %c0_i32 : i32, i32
  }
  func.func @transform_4(%arg0: i32) -> (i32, i32) {
    %c0_i32 = arith.constant 0 : i32
    %c0_i32_0 = arith.constant 0 : i32
    return %arg0, %c0_i32 : i32, i32
  }
}

</mosaic_0001>

<bundles_post_ra>
// kernel: tpu_custom_call.1
= control target key start
LH: loop header
LB: loop body
LE: loop exit
PB: predicated region body
PF: predicated region fallthrough
CT: control target
= control target key end

     0   :  { %10 = vsyncpa [#allocation6], 0  ;;  %s204_s0 = inlined_call_operand.vmem [shape: f32[4], index: 0, kind: input, shape index: {}]   ;;  %s205_s1 = inlined_call_operand.<no memory space> [shape: f32[1], index: 1, kind: input, shape index: {}]   ;;  %s206_s2 = inlined_call_operand.hbm [shape: f32[4,32], index: 2, kind: input, shape index: {}]   ;;  %s207_s3 = inlined_call_operand.vmem [shape: f32[2,16], index: 3, kind: input, shape index: {}]   ;;  %s208_s4 = inlined_call_operand.hbm [shape: f32[2,48], index: 4, kind: output, shape index: {}]  }
   0x1   :  { %11 = vsyncpa [#allocation4], 0 }
   0x2   :  { %12 = vsyncpa [#allocation5], 0  ;;  %s19_s17 = sshll.u32 %s204_s0, 4  ;;  %s20_s17 = int_to_ptr.vmem [resolvable:$true] %s19_s17 }
   0x3   :  { %s102_s18 = scalar_lea.vmem %s20_s17, 16  ;;  %p107_p1 = scmp.lt.s32.totalorder %s20_s17, %s20_s17 }
   0x4   :  { %p103_p0 = scmp.ne.s32.totalorder %s20_s17, %s102_s18  ;;  %p108_p2 = scmp.lt.s32.totalorder %s102_s18, %s102_s18 }
   0x6   :  { %p109_p3 = por %p108_p2, %p107_p1 }
   0x8   :  { %p110_p4 = pnand %p109_p3, %p103_p0 }
   0xa   :  { %113 = shalt.err (!%p110_p4)
}
   0xb   :  { %s160_s19 = smov [#allocation3]   ;;  %s161_s20 = smov [#allocation7]  }
   0xc   :  { %22 = dma.vmem_to_smem %s20_s17, 16, %s160_s19, [#allocation6]  }
   0xd   :  { %s31_s21 = sshll.u32 %s161_s20, 4  ;;  %s32_s21 = int_to_ptr.vmem [resolvable:$true] %s31_s21 }
   0xe   :  { %s122_s22 = scalar_lea.vmem %s32_s21, 64  ;;  %p127_p6 = scmp.lt.s32.totalorder %s32_s21, %s32_s21 }
   0xf   :  { %p123_p5 = scmp.ne.s32.totalorder %s32_s21, %s122_s22  ;;  %p128_p7 = scmp.lt.s32.totalorder %s122_s22, %s122_s22 }
  0x11   :  { %p129_p8 = por %p128_p7, %p127_p6 }
  0x13   :  { %p130_p9 = pnand %p129_p8, %p123_p5 }
  0x15   :  { %133 = shalt.err (!%p130_p9)
}
  0x16   :  { %34 = dma.hbm_to_vmem [thread:$0]  %s206_s2, 64, %s32_s21, [#allocation4]  }
  0x17   :  { %154 = dma.done.wait [#allocation6], 16  }
  0x18   :  { %155 = vsyncadd [#allocation6], 4294967280 }
  0x19   :  { %156 = dma.done.wait [#allocation4], 64  }
  0x1a   :  { %157 = vsyncadd [#allocation4], 4294967232 }
  0x1b   :  { %43 = sfence }
  0x1c   :  { %v72_v0 = vld [vmem:[%s207_s3] sm:$0x3]  ;;  %s44_s26 = sld [smem:[#allocation3]]  ;;  %s162_s27 = smov 32   ;;  %v54_v4 = vld [vmem:[#allocation7 + $0x2] sm:$0x1]  ;;  %v66_v5 = vlaneseq  ;;  %v64_v17 = vstv %s205_s1 }
  0x1d   :  { %74 = vrot.lane.b32.xlu0 %v72_v0, %s162_s27  ;;  %s95_s28 = sld [smem:[#allocation3 + $0x1]]  ;;  %v45_v1 = vld [vmem:[#allocation7] sm:$0x1]  ;;  %v49_v2 = vld [vmem:[#allocation7 + $0x1] sm:$0x1]  ;;  %vm70_vm0 = vcmask 254976  }
  0x1e   :  { %s96_s29 = sld [smem:[#allocation3 + $0x2]]  ;;  %v59_v8 = vld [vmem:[#allocation7 + $0x3] sm:$0x1]  ;;  %v67_v15 = vshrl.u32 %v66_v5, 7  ;;  %s163_s5 = smov [#allocation8]   ;;  %vm77_vm1 = vcmask 386304  }
  0x1f   :  { %s97_s30 = sld [smem:[#allocation3 + $0x3]]  ;;  %s85_s6 = sshll.u32 %s163_s5, 4  ;;  %s86_s6 = int_to_ptr.vmem [resolvable:$true] %s85_s6 }
  0x20   :  { %v68_v19 = vsub.s32 0, %v67_v15  ;;  %s134_s7 = scalar_lea.vmem %s86_s6, 32  ;;  %p139_p11 = scmp.lt.s32.totalorder %s86_s6, %s86_s6 }
  0x21   :  { %p135_p10 = scmp.ne.s32.totalorder %s86_s6, %s134_s7  ;;  %p140_p12 = scmp.lt.s32.totalorder %s134_s7, %s134_s7 }
  0x22   :  { %v46_v3 = vstv %s44_s26 }
  0x23   :  { %v47_v6 = vmul.f32 %v46_v3, %v45_v1  ;;  %v50_v7 = vstv %s95_s28  ;;  %p141_p13 = por %p140_p12, %p139_p11 }
  0x24   :  { %v51_v9 = vmul.f32 %v50_v7, %v49_v2  ;;  %v55_v10 = vstv %s96_s29 }
  0x25   :  { %v56_v11 = vmul.f32 %v55_v10, %v54_v4  ;;  %v60_v12 = vstv %s97_s30  ;;  %p142_p0 = pnand %p141_p13, %p135_p10 }
  0x26   :  { %v52_v13 = vadd.f32 %v51_v9, %v47_v6  ;;  %v61_v14 = vmul.f32 %v60_v12, %v59_v8 }
  0x28   :  { %v57_v16 = vadd.f32 %v56_v11, %v52_v13 }
  0x2a   :  { %v62_v18 = vadd.f32 %v61_v14, %v57_v16 }
  0x2c   :  { %v65_v20 = vadd.f32 %v64_v17, %v62_v18 }
  0x2e   :  { %v69_v21 = vrot.slane %v65_v20, %v68_v19 }
  0x30   :  { %71 = vst.msk [vmem:[#allocation8] sm:$0x3] %vm70_vm0, %v69_v21 }
  0x8f   :  { %v75_v22 = vpop.permute.xlu0 %74 }
  0x90   :  { %78 = vst.msk [vmem:[#allocation8] sm:$0x3] %vm77_vm1, %v75_v22 }
  0x91   :  { %145 = shalt.err (!%p142_p0)
}
  0x92   :  { %88 = dma.vmem_to_hbm [thread:$0]  %s86_s6, 32, %s208_s4, [#allocation5]  }
  0x93   :  { %158 = dma.done.wait [#allocation5], 32  }
  0x94   :  { %159 = vsyncadd [#allocation5], 4294967264 }
  0x95   :  { %92 = vsyncpa [#allocation4], 1 }
  0x96   :  { %93 = vsyncpa [#allocation5], 1 }
  0x97   :  { %94 = vsyncpa [#allocation6], 1 }

</bundles_post_ra>
